<compile_context>
chip_gen: v5e
topology: v5e:2x2
jax: 0.10.0
libtpu: 0.0.40
codegen_flags: <defaults>
</compile_context>

<pallas_src>
import functools
from typing import NamedTuple

import jax
import jax.numpy as jnp
from jax.experimental import pallas as pl
from jax.experimental.pallas import tpu as pltpu


_DEF_TN = 512  # 256-multiples: native for the 2x256x256 MXUs on v6e/v7x
_DEF_TK = 512
_TM_CAP = 4096  # keep batch-padding waste bounded for awkward batch sizes


def _round_up(x: int, m: int) -> int:
    return (x + m - 1) // m * m


def _sublane(dtype) -> int:
    # rows packed per sublane: 8 for 4-byte, 16 for 2-byte, 32 for 1-byte dtypes
    return {4: 8, 2: 16, 1: 32}.get(jnp.dtype(dtype).itemsize, 8)


def _vmem_capacity_bytes() -> int:
    try:
        cap = getattr(pltpu.get_tpu_info(), "vmem_capacity_bytes", None)
        if cap:
            return int(cap)
    except Exception:
        pass
    return 64 * 1024 * 1024  # conservative: v7x per-TensorCore


def _kn_tile(dim: int, tmax: int) -> int:
    """Tile for a K/N dim: whole (128-padded) dim if it fits, else a 256-multiple."""
    dim_p = _round_up(dim, 128)
    if dim_p <= tmax:
        return dim_p
    return _round_up(tmax, 256)


# ----------------------------------------------------------------------------
# Kernels
# ----------------------------------------------------------------------------
def _linear_relun_kernel_inplace(x_ref, w_ref, o_ref, *, act_thres, activation):
    """float32 output: the resident output block IS the accumulator."""
    @pl.when(pl.program_id(2) == 0)
    def _():
        o_ref[...] = jnp.zeros_like(o_ref)

    o_ref[...] += jnp.dot(
        x_ref[...], w_ref[...], preferred_element_type=jnp.float32
    )

    if activation:
        @pl.when(pl.program_id(2) == pl.num_programs(2) - 1)
        def _():
            o_ref[...] = jnp.clip(o_ref[...], 0.0, act_thres)  # ReLUN


def _linear_relun_kernel_scratch(x_ref, w_ref, o_ref, acc_ref, *, act_thres,
                                 activation):
    """Narrow output dtype: accumulate in an f32 VMEM scratch, cast on store."""
    @pl.when(pl.program_id(2) == 0)
    def _():
        acc_ref[...] = jnp.zeros_like(acc_ref)

    acc_ref[...] += jnp.dot(
        x_ref[...], w_ref[...], preferred_element_type=jnp.float32
    )

    @pl.when(pl.program_id(2) == pl.num_programs(2) - 1)
    def _():
        y = acc_ref[...]
        if activation:
            y = jnp.clip(y, 0.0, act_thres)  # ReLUN
        o_ref[...] = y.astype(o_ref.dtype)


# ----------------------------------------------------------------------------
# One-time weight preparation (parameter-init time, NOT per forward)
# ----------------------------------------------------------------------------
class PreparedWeight(NamedTuple):
    w_t: jax.Array        # [Kp, Np] = padded W^T in compute dtype
    in_features: int      # K (original)
    out_features: int     # N (original)
    tn: int
    tk: int


def prepare_weight(w_dense, compute_dtype=jnp.bfloat16) -> PreparedWeight:
    """[out, in] -> padded [Kp, Np] W^T in compute dtype (default bf16).

    Transpose, dtype cast and tile padding happen ONCE here, so the forward
    pass never re-reads/re-writes the whole weight in HBM just to reshape it.
    """
    N, K = w_dense.shape
    tn = _kn_tile(N, _DEF_TN)
    tk = _kn_tile(K, _DEF_TK)
    Np = _round_up(N, tn)
    Kp = _round_up(K, tk)

    w_t = jnp.transpose(w_dense).astype(compute_dtype)  # [K, N], out-features on lanes
    if (Kp, Np) != (K, N):
        w_t = jnp.pad(w_t, ((0, Kp - K), (0, Np - N)))
    return PreparedWeight(w_t=w_t, in_features=K, out_features=N, tn=tn, tk=tk)


# ----------------------------------------------------------------------------
# Forward
# ----------------------------------------------------------------------------
def linear_block_forward(x, pw: PreparedWeight, *, act_thres=6.0,
                         activation=True, out_dtype=None):
    """x: [B, in_features] -> clamp(x @ W^T, 0, act_thres): [B, out_features]."""
    B, K = x.shape
    assert K == pw.in_features, (K, pw.in_features)
    N = pw.out_features
    Kp, Np = pw.w_t.shape
    tn, tk = pw.tn, pw.tk

    out_dtype = out_dtype if out_dtype is not None else x.dtype
    compute_dtype = pw.w_t.dtype
    x = x.astype(compute_dtype)

    in_b = jnp.dtype(compute_dtype).itemsize
    out_b = jnp.dtype(out_dtype).itemsize
    use_scratch = out_b < 4  # f32 outputs accumulate in place, no scratch

    # --- tile sizes sized to the per-generation VMEM budget -----------------
    cap = _vmem_capacity_bytes()
    budget = cap // 2  # double-buffered tile footprint target (~32 MiB v7x, ~64 MiB v5e/v6e)
    sub = _sublane(compute_dtype)

    denom = 2 * tk * in_b + 2 * tn * out_b + (4 * tn if use_scratch else 0)
    tm_budget = max((budget - 2 * tk * tn * in_b) // denom, sub)
    tm = min((tm_budget // sub) * sub, _round_up(B, sub), _TM_CAP)
    tm = max((tm // sub) * sub, sub)
    Mp = _round_up(B, tm)

    # v7x: if the batch gives only one M tile, guarantee >= 2 parallel output
    # tiles (keep tn a 256-multiple) so both TensorCores get work.
    if Mp // tm == 1 and Np // tn == 1 and Np >= 512 and Np % 512 == 0:
        tn = Np // 2

    # Per-call padding of the activations only (weight was padded at prep time).
    if (Mp, Kp) != (B, K):
        x = jnp.pad(x, ((0, Mp - B), (0, Kp - K)))  # zero K-pad contributes 0

    grid = (Mp // tm, Np // tn, Kp // tk)

    # --- VMEM limit from the actual footprint + chip capacity ---------------
    footprint = (
        2 * (tm * tk + tk * tn) * in_b        # double-buffered input tiles
        + 2 * tm * tn * out_b                 # double-buffered output tile
        + (tm * tn * 4 if use_scratch else 0) # f32 scratch accumulator
    )
    vmem_limit = int(min(max(footprint + (4 << 20), 16 << 20), (cap * 3) // 4))

    # --- cost estimate with tile revisits (advisory) -------------------------
    cost = pl.CostEstimate(
        flops=2 * Mp * Kp * Np,
        transcendentals=0,
        bytes_accessed=(
            (Kp * Np * in_b) * (Mp // tm)   # W streamed once per M tile
            + (Mp * Kp * in_b) * (Np // tn) # X read once per N tile
            + Mp * Np * out_b               # output written once
        ),
    )

    if use_scratch:
        kernel = functools.partial(
            _linear_relun_kernel_scratch,
            act_thres=float(act_thres), activation=bool(activation))
        scratch_shapes = [pltpu.VMEM((tm, tn), jnp.float32)]
    else:
        kernel = functools.partial(
            _linear_relun_kernel_inplace,
            act_thres=float(act_thres), activation=bool(activation))
        scratch_shapes = []

    out_padded = pl.pallas_call(
        kernel,
        out_shape=jax.ShapeDtypeStruct((Mp, Np), out_dtype),
        grid_spec=pltpu.PrefetchScalarGridSpec(
            num_scalar_prefetch=0,
            grid=grid,
            in_specs=[
                pl.BlockSpec((tm, tk), lambda i, j, k: (i, k)),
                pl.BlockSpec((tk, tn), lambda i, j, k: (k, j)),
            ],
            out_specs=pl.BlockSpec((tm, tn), lambda i, j, k: (i, j)),
            scratch_shapes=scratch_shapes,
        ),
        compiler_params=pltpu.CompilerParams(
            dimension_semantics=("parallel", "parallel", "arbitrary"),
            vmem_limit_bytes=vmem_limit,
        ),
        cost_estimate=cost,
    )(x, pw.w_t)

    return out_padded[:B, :N]


# ----------------------------------------------------------------------------
# Deterministic SuperBlockLinear-style weight construction (for the demo)
# ----------------------------------------------------------------------------
def make_superblock_weight(key, in_features, out_features, mini_block=4,
                           dtype=jnp.float32):
    """Dense [out, in] weight assembled from mini_block x mini_block sub-blocks,
    mirroring SuperBlockLinear's blocked parameterization (deterministic init)."""
    p = out_features // mini_block
    q = in_features // mini_block
    blocks = jax.random.normal(key, (p, q, mini_block, mini_block), dtype=dtype)
    blocks = blocks * (1.0 / jnp.sqrt(jnp.float32(in_features))).astype(dtype)
    w_dense = jnp.transpose(blocks, (0, 2, 1, 3)).reshape(out_features, in_features)
    return w_dense


if __name__ == "__main__":
    key = jax.random.PRNGKey(0)
    k_x, k_w = jax.random.split(key)

    batch = 8
    in_features = 32
    out_features = 32
    mini_block = 4
    act_thres = 6.0

    x = jax.random.normal(k_x, (batch, in_features), dtype=jnp.float32)
    w_dense = make_superblock_weight(k_w, in_features, out_features, mini_block)

    # One-time weight prep: transpose + bf16 cast + tile padding, "at rest".
    pw = prepare_weight(w_dense)  # bf16 compute path by default

    # f32 output path (output block is the accumulator, no scratch).
    y = linear_block_forward(x, pw, act_thres=act_thres, activation=True)
    y = jax.block_until_ready(y)

    # bf16 output path (f32 VMEM scratch accumulator).
    y_bf16 = linear_block_forward(x, pw, act_thres=act_thres, activation=True,
                                  out_dtype=jnp.bfloat16)
    y_bf16 = jax.block_until_ready(y_bf16)

    # Reference with the same bf16-rounded operands (kernel accumulates in f32).
    x_b = x.astype(jnp.bfloat16).astype(jnp.float32)
    w_b = w_dense.astype(jnp.bfloat16).astype(jnp.float32)
    y_ref = jnp.clip(x_b @ w_b.T, 0.0, act_thres)

    assert y.shape == (batch, out_features) and y.dtype == jnp.float32
    assert y_bf16.shape == (batch, out_features) and y_bf16.dtype == jnp.bfloat16
    assert jnp.allclose(y, y_ref, atol=1e-3, rtol=1e-3)
    assert jnp.allclose(y_bf16.astype(jnp.float32), y_ref, atol=5e-2, rtol=5e-2)

    print("KERNEL_OK")
</pallas_src>

<mosaic_0001>
module attributes {stable_mosaic.version = 11 : i64} {
  func.func @_linear_relun_kernel_inplace(%arg0: i32, %arg1: i32, %arg2: i32, %arg3: memref<16x128xbf16, #tpu.memory_space<vmem>>, %arg4: memref<128x128xbf16, #tpu.memory_space<vmem>>, %arg5: memref<16x128xf32, #tpu.memory_space<vmem>>) attributes {dimension_semantics = [#tpu.dimension_semantics<parallel>, #tpu.dimension_semantics<parallel>, #tpu.dimension_semantics<arbitrary>], iteration_bounds = array<i64: 1, 1, 1>, scalar_prefetch = 0 : i64, scratch_operands = 0 : i64, tpu.core_type = #tpu.core_type<tc>, window_params = [{transform_indices = @transform_0, window_bounds = array<i64: 16, 128>}, {transform_indices = @transform_1, window_bounds = array<i64: 128, 128>}, {transform_indices = @transform_2, window_bounds = array<i64: 16, 128>}]} {
    %c0_i32 = arith.constant 0 : i32
    %0 = arith.cmpi eq, %arg2, %c0_i32 : i32
    %1 = arith.extui %0 : i1 to i32
    %c0_i32_0 = arith.constant 0 : i32
    %2 = arith.cmpi ne, %1, %c0_i32_0 : i32
    scf.if %2 {
      %cst_10 = arith.constant 0.000000e+00 : f32
      %12 = vector.broadcast %cst_10 : f32 to vector<16x128xf32>
      %c0_11 = arith.constant 0 : index
      %c0_12 = arith.constant 0 : index
      %13 = vector.load %arg5[%c0_11, %c0_12] : memref<16x128xf32, #tpu.memory_space<vmem>>, vector<16x128xf32>
      tpu.vector_store %arg5[%c0_11, %c0_12], %12 {strides = array<i32>} : memref<16x128xf32, #tpu.memory_space<vmem>>, vector<16x128xf32>,
    } else {
    }
    %c0 = arith.constant 0 : index
    %c0_1 = arith.constant 0 : index
    %3 = vector.load %arg5[%c0, %c0_1] : memref<16x128xf32, #tpu.memory_space<vmem>>, vector<16x128xf32>
    %c0_2 = arith.constant 0 : index
    %c0_3 = arith.constant 0 : index
    %4 = vector.load %arg3[%c0_2, %c0_3] : memref<16x128xbf16, #tpu.memory_space<vmem>>, vector<16x128xbf16>
    %c0_4 = arith.constant 0 : index
    %c0_5 = arith.constant 0 : index
    %5 = vector.load %arg4[%c0_4, %c0_5] : memref<128x128xbf16, #tpu.memory_space<vmem>>, vector<128x128xbf16>
    %cst = arith.constant dense<0.000000e+00> : vector<16x128xf32>
    %6 = tpu.matmul %4, %5, %cst {dimension_numbers = #tpu.dot_dimension_numbers<[1], [0], [0], [1], [0, 0, 1, 1], [], []>} : vector<16x128xbf16>, vector<128x128xbf16>, vector<16x128xf32> -> vector<16x128xf32>
    %7 = arith.addf %3, %6 : vector<16x128xf32>
    %c0_6 = arith.constant 0 : index
    %c0_7 = arith.constant 0 : index
    %8 = vector.load %arg5[%c0_6, %c0_7] : memref<16x128xf32, #tpu.memory_space<vmem>>, vector<16x128xf32>
    tpu.vector_store %arg5[%c0_6, %c0_7], %7 {strides = array<i32>} : memref<16x128xf32, #tpu.memory_space<vmem>>, vector<16x128xf32>,
    %c0_i32_8 = arith.constant 0 : i32
    %9 = arith.cmpi eq, %arg2, %c0_i32_8 : i32
    %10 = arith.extui %9 : i1 to i32
    %c0_i32_9 = arith.constant 0 : i32
    %11 = arith.cmpi ne, %10, %c0_i32_9 : i32
    scf.if %11 {
      %c0_10 = arith.constant 0 : index
      %c0_11 = arith.constant 0 : index
      %12 = vector.load %arg5[%c0_10, %c0_11] : memref<16x128xf32, #tpu.memory_space<vmem>>, vector<16x128xf32>
      %cst_12 = arith.constant 0.000000e+00 : f32
      %cst_13 = arith.constant 6.000000e+00 : f32
      %13 = vector.broadcast %cst_12 : f32 to vector<16x128xf32>
      %14 = arith.maximumf %13, %12 : vector<16x128xf32>
      %15 = vector.broadcast %cst_13 : f32 to vector<16x128xf32>
      %16 = arith.minimumf %15, %14 : vector<16x128xf32>
      %c0_14 = arith.constant 0 : index
      %c0_15 = arith.constant 0 : index
      %17 = vector.load %arg5[%c0_14, %c0_15] : memref<16x128xf32, #tpu.memory_space<vmem>>, vector<16x128xf32>
      tpu.vector_store %arg5[%c0_14, %c0_15], %16 {strides = array<i32>} : memref<16x128xf32, #tpu.memory_space<vmem>>, vector<16x128xf32>,
    } else {
    }
    return
  }
  func.func @transform_0(%arg0: i32, %arg1: i32, %arg2: i32) -> (i32, i32) {
    %c0_i32 = arith.constant 0 : i32
    return %arg0, %arg2 : i32, i32
  }
  func.func @transform_1(%arg0: i32, %arg1: i32, %arg2: i32) -> (i32, i32) {
    %c0_i32 = arith.constant 0 : i32
    return %arg2, %arg1 : i32, i32
  }
  func.func @transform_2(%arg0: i32, %arg1: i32, %arg2: i32) -> (i32, i32) {
    %c0_i32 = arith.constant 0 : i32
    return %arg0, %arg1 : i32, i32
  }
}

</mosaic_0001>

<bundles_post_ra>
// kernel: tpu_custom_call.1
= control target key start
LH: loop header
LB: loop body
LE: loop exit
PB: predicated region body
PF: predicated region fallthrough
CT: control target
= control target key end

     0   :  { %7 = vsyncpa [#allocation3], 0  ;;  %s335_s0 = inlined_call_operand.hbm [shape: bf16[16,128], index: 0, kind: input, shape index: {}]   ;;  %s336_s1 = inlined_call_operand.hbm [shape: bf16[128,128], index: 1, kind: input, shape index: {}]   ;;  %s337_s2 = inlined_call_operand.hbm [shape: f32[16,128], index: 2, kind: output, shape index: {}]  }
   0x1   :  { %8 = vsyncpa [#allocation6], 0 }
   0x2   :  { %9 = vsyncpa [#allocation4], 0  ;;  %s14_s11 = sshll.u32 %s335_s0, 4  ;;  %s304_s12 = smov [#allocation2]   ;;  %s15_s11 = int_to_ptr.hbm [resolvable:$true] %s14_s11 }
   0x3   :  { %s16_s13 = sshll.u32 %s304_s12, 4  ;;  %s27_s16 = sshll.u32 %s336_s1, 4  ;;  %s17_s13 = int_to_ptr.vmem [resolvable:$true] %s16_s13  ;;  %s28_s16 = int_to_ptr.hbm [resolvable:$true] %s27_s16 }
   0x4   :  { %s305_s17 = smov 64   ;;  %s306_s18 = smov 4  }
   0x5   :  { %22 = dma.hbm_to_vmem [thread:$0]  %s15_s11, 128, %s17_s13, [#allocation3], %s305_s17, %s305_s17, %s306_s18  }
   0x6   :  { %s307_s19 = smov [#allocation5]  }
   0x7   :  { %s29_s20 = sshll.u32 %s307_s19, 4  ;;  %s30_s20 = int_to_ptr.vmem [resolvable:$true] %s29_s20 }
   0x8   :  { %35 = dma.hbm_to_vmem [thread:$0]  %s28_s16, 1024, %s30_s20, [#allocation6], %s305_s17, %s305_s17, %s306_s18  }
   0x9   :  { %298 = dma.done.wait [#allocation3], 128  }
   0xa   :  { %299 = vsyncadd [#allocation3], 4294967168 }
   0xb   :  { %300 = dma.done.wait [#allocation6], 1024  }
   0xc   :  { %301 = vsyncadd [#allocation6], 4294966272  ;;  %v217_v0 = vld [vmem:[#allocation5 + $0x38] sm:$0xff]  ;;  %v216_v1 = vld [vmem:[#allocation5 + $0x30] sm:$0xff]  ;;  %s308_s0 = smov [#allocation7]   ;;  %s159_s23 = sshll.u32 %s337_s2, 4  ;;  %s160_s23 = int_to_ptr.hbm [resolvable:$true] %s159_s23 }
   0xd   :  { %124 = vmatpush.bf16.msra.mxu0 %v217_v0  ;;  %v215_v2 = vld [vmem:[#allocation5 + $0x28] sm:$0xff]  ;;  %v214_v3 = vld [vmem:[#allocation5 + $0x20] sm:$0xff]  ;;  %v213_v4 = vld [vmem:[#allocation5 + $0x18] sm:$0xff]  ;;  %s157_s1 = sshll.u32 %s308_s0, 4  ;;  %s309_s24 = smov 128   ;;  %s158_s1 = int_to_ptr.vmem [resolvable:$true] %s157_s1 }
   0xe   :  { %v212_v5 = vld [vmem:[#allocation5 + $0x10] sm:$0xff]  ;;  %v211_v6 = vld [vmem:[#allocation5 + $0x8] sm:$0xff]  ;;  %v210_v7 = vld [vmem:[#allocation5] sm:$0xff]  ;;  %s310_s25 = smov 8  }
   0xf   :  { %v209_v8 = vld [vmem:[#allocation2] sm:$0xff] }
  0x11   :  { %125 = vmatpush.bf16.msra.mxu0 %v216_v1 }
  0x15   :  { %126 = vmatpush.bf16.msra.mxu0 %v215_v2 }
  0x19   :  { %127 = vmatpush.bf16.msra.mxu0 %v214_v3 }
  0x1d   :  { %128 = vmatpush.bf16.msra.mxu0 %v213_v4 }
  0x21   :  { %129 = vmatpush.bf16.msra.mxu0 %v212_v5 }
  0x25   :  { %130 = vmatpush.bf16.msra.mxu0 %v211_v6 }
  0x29   :  { %131 = vmatpush.bf16.msra.mxu0 %v210_v7 }
  0x2c   :  { %132 = vmatmul.bf16.vlgmr.msra.gmra.mxu0 %v209_v8 }
  0xa9   :  { %v133_v9 = vpop.f32.mrf.mxu0 }
  0xaa   :  { %v147_v10 = vmax.f32 %v133_v9, 0.0 }
  0xac   :  { %v149_v11 = vmin.f32 %v147_v10, 6.0 }
  0xae   :  { %151 = vst [vmem:[#allocation7] sm:$0xff] %v149_v11 }
  0xb1   :  { %v135_v12 = vpop.f32.mrf.mxu0 }
  0xb2   :  { %v148_v13 = vmax.f32 %v135_v12, 0.0 }
  0xb4   :  { %v150_v14 = vmin.f32 %v148_v13, 6.0 }
  0xb6   :  { %152 = vst [vmem:[#allocation7 + $0x8] sm:$0xff] %v150_v14 }
  0xb7   :  { %165 = dma.vmem_to_hbm [thread:$0]  %s158_s1, 256, %s160_s23, [#allocation4], %s309_s24, %s309_s24, %s310_s25  }
  0xb8   :  { %302 = dma.done.wait [#allocation4], 256  }
  0xb9   :  { %303 = vsyncadd [#allocation4], 4294967040 }
  0xba   :  { %170 = vsyncpa [#allocation3], 1 }
  0xbb   :  { %171 = vsyncpa [#allocation6], 1 }
  0xbc   :  { %172 = vsyncpa [#allocation4], 1 }

</bundles_post_ra>
